<compile_context>
chip_gen: v7x
topology: tpu7x:2x2x1
jax: 0.10.0
libtpu: 0.0.40
codegen_flags: <defaults>
</compile_context>

<pallas_src>
import functools
import math

import jax
import jax.numpy as jnp
from jax.experimental import pallas as pl
from jax.experimental.pallas import tpu as pltpu


def _wmse_kernel(p_ref, t_ref, w_ref, o_ref, acc_ref, *,
                 tile_rows, total_rows, needs_mask):
    j = pl.program_id(1)

    @pl.when(j == 0)
    def _():
        acc_ref[...] = jnp.zeros_like(acc_ref)

    d = p_ref[...].astype(jnp.float32) - t_ref[...].astype(jnp.float32)

    if needs_mask:
        # Global row index of each local row; rows past the real row count contribute 0.
        row_start = (pl.program_id(0) * pl.num_programs(1) + j) * tile_rows
        rows = row_start + jax.lax.broadcasted_iota(jnp.int32, (tile_rows, 1), 0)
        d = jnp.where(rows < total_rows, d, 0.0)

    # (tile_rows, HW) * (tile_rows, 1) -> weighted squared errors.
    weighted = d * d * w_ref[...]

    # Fold row-groups of 8 into the vreg-shaped accumulator: pure VPU adds, no per-step XLU reduce.
    g = tile_rows // 8
    hw = weighted.shape[1]
    acc_ref[...] += weighted.reshape(g, 8, hw).sum(axis=0)

    @pl.when(j == pl.num_programs(1) - 1)
    def _():
        o_ref[...] = acc_ref[...]


def weighted_mse_loss(y_pred, y_true, weights, *,
                      target_block_bytes=2 * 1024 * 1024, num_parallel=2):
    """y_pred, y_true: (N, C, H, W); weights: (C,). Returns scalar f32 loss."""
    N, C, H, W = y_pred.shape
    R = N * C
    HW = H * W
    itemsize = jnp.dtype(y_pred.dtype).itemsize

    p2 = y_pred.reshape(R, HW)           # native dtype, no upcast copy in HBM
    t2 = y_true.reshape(R, HW)

    # Row granularity: multiple of 8 (sublane) AND of C (so the weight pattern repeats per tile).
    base = math.lcm(8, C)
    if R < base:                         # tiny-input fallback: pad a handful of zero rows
        p2 = jnp.pad(p2, ((0, base - R), (0, 0)))
        t2 = jnp.pad(t2, ((0, base - R), (0, 0)))
    r_rows = p2.shape[0]

    # Pick tile_rows: multiple of `base`, <= row count, targeting ~target_block_bytes per input block.
    max_rows = (r_rows // base) * base
    rows_target = max(1, target_block_bytes // max(1, HW * itemsize))
    tile_rows = min(max_rows, max(base, (rows_target // base) * base))

    num_tiles = pl.cdiv(r_rows, tile_rows)
    P = min(num_parallel, num_tiles)          # v7x megacore split; no-op elsewhere
    tiles_per_part = pl.cdiv(num_tiles, P)
    needs_mask = (P * tiles_per_part * tile_rows) != r_rows

    # Resident per-tile weight column: row l -> weights[l % C] (phase matches every tile).
    w_col = jnp.tile(weights.astype(jnp.float32), tile_rows // C).reshape(tile_rows, 1)

    kernel = functools.partial(_wmse_kernel, tile_rows=tile_rows,
                               total_rows=r_rows, needs_mask=needs_mask)

    def data_map(p, j):
        # Clamp so fully-overflowing tiles (masked to zero anyway) never DMA out of bounds.
        return (jnp.minimum(p * tiles_per_part + j, num_tiles - 1), 0)

    out = pl.pallas_call(
        kernel,
        out_shape=jax.ShapeDtypeStruct((P * 8, HW), jnp.float32),
        grid_spec=pltpu.PrefetchScalarGridSpec(
            num_scalar_prefetch=0,
            grid=(P, tiles_per_part),
            in_specs=[
                pl.BlockSpec((tile_rows, HW), data_map),
                pl.BlockSpec((tile_rows, HW), data_map),
                pl.BlockSpec((tile_rows, 1), lambda p, j: (0, 0)),  # fetched once, stays resident
            ],
            out_specs=pl.BlockSpec((8, HW), lambda p, j: (p, 0)),
            scratch_shapes=[pltpu.VMEM((8, HW), jnp.float32)],
        ),
        compiler_params=pltpu.CompilerParams(
            dimension_semantics=("parallel", "arbitrary"),
            vmem_limit_bytes=32 * 1024 * 1024,
        ),
        cost_estimate=pl.CostEstimate(
            flops=4 * R * HW,
            transcendentals=0,
            bytes_accessed=2 * R * HW * itemsize + P * 8 * HW * 4,
        ),
    )(p2, t2, w_col)

    # Single cheap final reduction of the tiny per-core lane/sublane partials.
    return jnp.sum(out) * (1.0 / float(N * C * H * W))


def _reference(y_pred, y_true, weights):
    se = jnp.square(y_pred.astype(jnp.float32) - y_true.astype(jnp.float32))   # NCHW
    se_nhwc = jnp.transpose(se, (0, 2, 3, 1)) * weights.astype(jnp.float32)
    return jnp.mean(jnp.transpose(se_nhwc, (0, 3, 1, 2)))


if __name__ == "__main__":
    key = jax.random.PRNGKey(0)
    k1, k2, k3 = jax.random.split(key, 3)

    N, C, H, W = 2, 4, 16, 16
    y_pred = jax.random.normal(k1, (N, C, H, W), dtype=jnp.float32)
    y_true = jax.random.normal(k2, (N, C, H, W), dtype=jnp.float32)
    weights = jax.random.uniform(k3, (C,), dtype=jnp.float32) + 0.5

    loss = jax.block_until_ready(weighted_mse_loss(y_pred, y_true, weights))
    ref = jax.block_until_ready(_reference(y_pred, y_true, weights))

    assert jnp.allclose(loss, ref, rtol=1e-5, atol=1e-6), (loss, ref)
    print("KERNEL_OK")
</pallas_src>

<mosaic_0001>
module attributes {stable_mosaic.version = 11 : i64} {
  func.func @_wmse_kernel(%arg0: i32, %arg1: i32, %arg2: memref<8x256xf32, #tpu.memory_space<vmem>>, %arg3: memref<8x256xf32, #tpu.memory_space<vmem>>, %arg4: memref<8x1xf32, #tpu.memory_space<vmem>>, %arg5: memref<8x256xf32, #tpu.memory_space<vmem>>, %arg6: memref<8x256xf32, #tpu.memory_space<vmem>>) attributes {dimension_semantics = [#tpu.dimension_semantics<parallel>, #tpu.dimension_semantics<arbitrary>], iteration_bounds = array<i64: 1, 1>, scalar_prefetch = 0 : i64, scratch_operands = 1 : i64, tpu.core_type = #tpu.core_type<tc>, window_params = [{transform_indices = @transform_0, window_bounds = array<i64: 8, 256>}, {transform_indices = @transform_1, window_bounds = array<i64: 8, 256>}, {pipeline_mode = #tpu.pipeline_mode<synchronous>, transform_indices = @transform_2, window_bounds = array<i64: 8, 1>}, {transform_indices = @transform_3, window_bounds = array<i64: 8, 256>}]} {
    %c0_i32 = arith.constant 0 : i32
    %0 = arith.cmpi eq, %arg1, %c0_i32 : i32
    %1 = arith.extui %0 : i1 to i32
    %c0_i32_0 = arith.constant 0 : i32
    %2 = arith.cmpi ne, %1, %c0_i32_0 : i32
    scf.if %2 {
      %cst_12 = arith.constant 0.000000e+00 : f32
      %18 = vector.broadcast %cst_12 : f32 to vector<8x256xf32>
      %c0_13 = arith.constant 0 : index
      %c0_14 = arith.constant 0 : index
      %19 = vector.load %arg6[%c0_13, %c0_14] : memref<8x256xf32, #tpu.memory_space<vmem>>, vector<8x256xf32>
      tpu.vector_store %arg6[%c0_13, %c0_14], %18 {strides = array<i32>} : memref<8x256xf32, #tpu.memory_space<vmem>>, vector<8x256xf32>,
    } else {
    }
    %c0 = arith.constant 0 : index
    %c0_1 = arith.constant 0 : index
    %3 = vector.load %arg2[%c0, %c0_1] : memref<8x256xf32, #tpu.memory_space<vmem>>, vector<8x256xf32>
    %c0_2 = arith.constant 0 : index
    %c0_3 = arith.constant 0 : index
    %4 = vector.load %arg3[%c0_2, %c0_3] : memref<8x256xf32, #tpu.memory_space<vmem>>, vector<8x256xf32>
    %5 = arith.subf %3, %4 : vector<8x256xf32>
    %6 = arith.mulf %5, %5 : vector<8x256xf32>
    %c0_4 = arith.constant 0 : index
    %c0_5 = arith.constant 0 : index
    %7 = vector.load %arg4[%c0_4, %c0_5] : memref<8x1xf32, #tpu.memory_space<vmem>>, vector<8x1xf32>
    %8 = vector.broadcast %7 : vector<8x1xf32> to vector<8x256xf32>
    %9 = arith.mulf %6, %8 : vector<8x256xf32>
    %c0_6 = arith.constant 0 : index
    %c0_7 = arith.constant 0 : index
    %10 = vector.load %arg6[%c0_6, %c0_7] : memref<8x256xf32, #tpu.memory_space<vmem>>, vector<8x256xf32>
    %11 = vector.shape_cast %9 : vector<8x256xf32> to vector<1x8x256xf32>
    %cst = arith.constant dense<0.000000e+00> : vector<8x256xf32>
    %12 = vector.multi_reduction <add>, %11, %cst [0] : vector<1x8x256xf32> to vector<8x256xf32>
    %13 = arith.addf %10, %12 : vector<8x256xf32>
    %c0_8 = arith.constant 0 : index
    %c0_9 = arith.constant 0 : index
    %14 = vector.load %arg6[%c0_8, %c0_9] : memref<8x256xf32, #tpu.memory_space<vmem>>, vector<8x256xf32>
    tpu.vector_store %arg6[%c0_8, %c0_9], %13 {strides = array<i32>} : memref<8x256xf32, #tpu.memory_space<vmem>>, vector<8x256xf32>,
    %c0_i32_10 = arith.constant 0 : i32
    %15 = arith.cmpi eq, %arg1, %c0_i32_10 : i32
    %16 = arith.extui %15 : i1 to i32
    %c0_i32_11 = arith.constant 0 : i32
    %17 = arith.cmpi ne, %16, %c0_i32_11 : i32
    scf.if %17 {
      %c0_12 = arith.constant 0 : index
      %c0_13 = arith.constant 0 : index
      %18 = vector.load %arg6[%c0_12, %c0_13] : memref<8x256xf32, #tpu.memory_space<vmem>>, vector<8x256xf32>
      %c0_14 = arith.constant 0 : index
      %c0_15 = arith.constant 0 : index
      %19 = vector.load %arg5[%c0_14, %c0_15] : memref<8x256xf32, #tpu.memory_space<vmem>>, vector<8x256xf32>
      tpu.vector_store %arg5[%c0_14, %c0_15], %18 {strides = array<i32>} : memref<8x256xf32, #tpu.memory_space<vmem>>, vector<8x256xf32>,
    } else {
    }
    return
  }
  func.func @transform_0(%arg0: i32, %arg1: i32) -> (i32, i32) {
    %c1_i32 = arith.constant 1 : i32
    %0 = arith.muli %arg0, %c1_i32 : i32
    %1 = arith.addi %0, %arg1 : i32
    %c0_i32 = arith.constant 0 : i32
    %2 = arith.minsi %1, %c0_i32 : i32
    %c0_i32_0 = arith.constant 0 : i32
    %c0_i32_1 = arith.constant 0 : i32
    return %2, %c0_i32_0 : i32, i32
  }
  func.func @transform_1(%arg0: i32, %arg1: i32) -> (i32, i32) {
    %c1_i32 = arith.constant 1 : i32
    %0 = arith.muli %arg0, %c1_i32 : i32
    %1 = arith.addi %0, %arg1 : i32
    %c0_i32 = arith.constant 0 : i32
    %2 = arith.minsi %1, %c0_i32 : i32
    %c0_i32_0 = arith.constant 0 : i32
    %c0_i32_1 = arith.constant 0 : i32
    return %2, %c0_i32_0 : i32, i32
  }
  func.func @transform_2(%arg0: i32, %arg1: i32) -> (i32, i32) {
    %c0_i32 = arith.constant 0 : i32
    %c0_i32_0 = arith.constant 0 : i32
    %c0_i32_1 = arith.constant 0 : i32
    return %c0_i32, %c0_i32_0 : i32, i32
  }
  func.func @transform_3(%arg0: i32, %arg1: i32) -> (i32, i32) {
    %c0_i32 = arith.constant 0 : i32
    %c0_i32_0 = arith.constant 0 : i32
    return %arg0, %c0_i32 : i32, i32
  }
}

</mosaic_0001>

<bundles_post_ra>
// kernel: tpu_custom_call.1
= control target key start
LH: loop header
LB: loop body
LE: loop exit
PB: predicated region body
PF: predicated region fallthrough
CT: control target
= control target key end

     0   :  { %8 = vsyncpa [#allocation4], 0  ;;  %s254_s0 = inlined_call_operand.hbm [shape: f32[8,256], index: 0, kind: input, shape index: {}]   ;;  %s255_s1 = inlined_call_operand.hbm [shape: f32[8,256], index: 1, kind: input, shape index: {}]   ;;  %s256_s2 = inlined_call_operand.vmem [shape: f32[8,1], index: 2, kind: input, shape index: {}]   ;;  %s257_s3 = inlined_call_operand.hbm [shape: f32[8,256], index: 3, kind: output, shape index: {}]  }
   0x1   :  { %9 = vsyncpa [#allocation7], 0 }
   0x2   :  { %10 = vsyncpa [#allocation5], 0  ;;  %s191_s12 = smov [#allocation3]   ;;  %s192_s14 = smov [#allocation6]  }
   0x3   :  { %s23_s13 = sshll.u32 %s191_s12, 4  ;;  %s39_s15 = sshll.u32 %s192_s14, 4  ;;  %s24_s13 = int_to_ptr.vmem [resolvable:$true] %s23_s13  ;;  %s40_s15 = int_to_ptr.vmem [resolvable:$true] %s39_s15 }
   0x4   :  { %s119_s18 = scalar_lea.hbm %s254_s0, 256 }
   0x5   :  { %p120_p0 = scmp.ne.s32.totalorder %s254_s0, %s119_s18  ;;  %p123_p1 = scmp.lt.u32.totalorder %s119_s18, %s254_s0 }
   0x7   :  { %p125_p2 = pnand %p123_p1, %p120_p0 }
   0x9   :  { %128 = shalt.err (!%p125_p2)
}
   0xa   :  { %s129_s23 = scalar_lea.vmem %s24_s13, 256  ;;  %p134_p4 = scmp.lt.s32.totalorder %s24_s13, %s24_s13 }
   0xb   :  { %p130_p3 = scmp.ne.s32.totalorder %s24_s13, %s129_s23  ;;  %p135_p5 = scmp.lt.s32.totalorder %s129_s23, %s129_s23 }
   0xd   :  { %p136_p6 = por %p135_p5, %p134_p4 }
   0xf   :  { %p137_p7 = pnand %p136_p6, %p130_p3 }
  0x11   :  { %140 = shalt.err (!%p137_p7)
}
  0x12   :  { %26 = dma.hbm_to_vmem [thread:$0]  %s254_s0, 256, %s24_s13, [#allocation4]  }
  0x13   :  { %s141_s28 = scalar_lea.hbm %s255_s1, 256 }
  0x14   :  { %p142_p8 = scmp.ne.s32.totalorder %s255_s1, %s141_s28  ;;  %p145_p9 = scmp.lt.u32.totalorder %s141_s28, %s255_s1 }
  0x16   :  { %p147_p10 = pnand %p145_p9, %p142_p8 }
  0x18   :  { %150 = shalt.err (!%p147_p10)
}
  0x19   :  { %s151_s6 = scalar_lea.vmem %s40_s15, 256  ;;  %p156_p12 = scmp.lt.s32.totalorder %s40_s15, %s40_s15 }
  0x1a   :  { %p152_p11 = scmp.ne.s32.totalorder %s40_s15, %s151_s6  ;;  %p157_p13 = scmp.lt.s32.totalorder %s151_s6, %s151_s6 }
  0x1c   :  { %p158_p0 = por %p157_p13, %p156_p12 }
  0x1e   :  { %p159_p1 = pnand %p158_p0, %p152_p11 }
  0x20   :  { %162 = shalt.err (!%p159_p1)
}
  0x21   :  { %42 = dma.hbm_to_vmem [thread:$0]  %s255_s1, 256, %s40_s15, [#allocation7]  }
  0x22   :  { %185 = dma.done.wait [#allocation4], 256  }
  0x23   :  { %186 = vsyncadd [#allocation4], 4294967040 }
  0x24   :  { %187 = dma.done.wait [#allocation7], 256  }
  0x25   :  { %188 = vsyncadd [#allocation7], 4294967040  ;;  %v193_v0 = vmov 0   ;;  %v71_v1 = vld [vmem:[%s256_s2] sm:$0xff]  ;;  %v64_v3 = vld [vmem:[#allocation3 + $0x8] sm:$0xff]  ;;  %s194_s1 = smov [#allocation8]  }
  0x26   :  { %118 = vset.pattern.permute.xlu0 %v193_v0  ;;  %v63_v2 = vld [vmem:[#allocation3] sm:$0xff]  ;;  %v65_v4 = vld [vmem:[#allocation6] sm:$0xff]  ;;  %v66_v5 = vld [vmem:[#allocation6 + $0x8] sm:$0xff]  ;;  %s100_s10 = sshll.u32 %s194_s1, 4  ;;  %s101_s10 = int_to_ptr.vmem [resolvable:$true] %s100_s10 }
  0x27   :  { %74 = vperm.xlu0 %118, %v71_v1   ;;  %v67_v6 = vsub.f32 %v63_v2, %v65_v4  ;;  %v68_v7 = vsub.f32 %v64_v3, %v66_v5  ;;  %s163_s11 = scalar_lea.vmem %s101_s10, 256  ;;  %p168_p3 = scmp.lt.s32.totalorder %s101_s10, %s101_s10 }
  0x28   :  { %p164_p2 = scmp.ne.s32.totalorder %s101_s10, %s163_s11  ;;  %p169_p4 = scmp.lt.s32.totalorder %s163_s11, %s163_s11 }
  0x29   :  { %v69_v8 = vmul.f32 %v67_v6, %v67_v6  ;;  %v70_v9 = vmul.f32 %v68_v7, %v68_v7 }
  0x2a   :  { %p170_p5 = por %p169_p4, %p168_p3 }
  0x2c   :  { %p171_p6 = pnand %p170_p5, %p164_p2 }
  0xa6   :  { %v75_v10 = vpop.permute.xlu0 %74 }
  0xa7   :  { %v77_v11 = vmul.f32 %v75_v10, %v69_v8  ;;  %v78_v12 = vmul.f32 %v75_v10, %v70_v9 }
  0xa9   :  { %92 = vst [vmem:[#allocation8] sm:$0xff] %v77_v11  ;;  %93 = vst [vmem:[#allocation8 + $0x8] sm:$0xff] %v78_v12 }
  0xaa   :  { %174 = shalt.err (!%p171_p6)
}
  0xab   :  { %s175_s13 = scalar_lea.hbm %s257_s3, 256 }
  0xac   :  { %p176_p7 = scmp.ne.s32.totalorder %s257_s3, %s175_s13  ;;  %p179_p8 = scmp.lt.u32.totalorder %s175_s13, %s257_s3 }
  0xae   :  { %p181_p9 = pnand %p179_p8, %p176_p7 }
  0xb0   :  { %184 = shalt.err (!%p181_p9)
}
  0xb1   :  { %103 = dma.vmem_to_hbm [thread:$0]  %s101_s10, 256, %s257_s3, [#allocation5]  }
  0xb2   :  { %189 = dma.done.wait [#allocation5], 256  }
  0xb3   :  { %190 = vsyncadd [#allocation5], 4294967040 }
  0xb4   :  { %107 = vsyncpa [#allocation4], 1 }
  0xb5   :  { %108 = vsyncpa [#allocation7], 1 }
  0xb6   :  { %109 = vsyncpa [#allocation5], 1 }

</bundles_post_ra>
